<compile_context>
chip_gen: v5e
topology: v5e:2x2
jax: 0.10.0
libtpu: 0.0.40
codegen_flags: <defaults>
</compile_context>

<pallas_src>
import math

import jax
import jax.numpy as jnp
import numpy as np
from jax.experimental import pallas as pl
from jax.experimental.pallas import tpu as pltpu

_LANES = 128


def _round_up(x, m):
    return ((x + m - 1) // m) * m


def _pick_channel_block(channel, per_channel_bytes, budget_bytes):
    """Largest divisor of `channel` whose per-step input bytes fit the budget."""
    cb = max(1, min(channel, budget_bytes // max(per_channel_bytes, 1)))
    while channel % cb:
        cb -= 1
    return cb


def _pad_minor(x, minor):
    """Zero-pad the last dim of `x` up to `minor` (lane-dense store width)."""
    s = x.shape[-1]
    if minor == s:
        return x
    pad = jnp.zeros(x.shape[:-1] + (minor - s,), x.dtype)
    return jnp.concatenate([x, pad], axis=-1)


def _dac_mean_attention(q_ps, k_ps, q_pn, k_pn, channel, scale_ps, scale_pn,
                        *, compute_dtype=jnp.bfloat16,
                        vmem_input_budget_bytes=8 << 20):
    """Channel-mean softmax attention for both DCdetector branches.

    Inputs are in the PyTorch layout (B*C, L, H, E).  Returns
    (B, H, L_ps, S_ps) and (B, H, L_pn, S_pn) float32 attention maps, already
    averaged over the `channel` group.
    """
    BC, L_ps, H, E_ps = q_ps.shape
    S_ps = k_ps.shape[1]
    _, L_pn, _, E_pn = q_pn.shape
    S_pn = k_pn.shape[1]
    assert BC % channel == 0
    Bo = BC // channel

    # ---- Layout glue: (B*C, L, H, E) -> (B, C*H, L, E), channel-major. --------
    # H == 1 (DCdetector default): pure reshape, zero-cost.  H > 1: one fused
    # transpose per input (see header note on why BlockSpec head-select is not
    # used here).
    def to_gle(x):
        _, L, H_, E = x.shape
        x = x.reshape(Bo, channel, L, H_, E)
        if H_ == 1:
            return x.reshape(Bo, channel, L, E)
        x = jnp.transpose(x, (0, 1, 3, 2, 4))          # (B, C, H, L, E)
        return x.reshape(Bo, channel * H_, L, E)       # channel-major, head-minor

    qps, kps, qpn, kpn = (to_gle(x) for x in (q_ps, k_ps, q_pn, k_pn))

    # ---- Channel-block split: VMEM guard for production shapes. ---------------
    in_itemsize = jnp.dtype(q_ps.dtype).itemsize
    per_channel_bytes = (2 * H * in_itemsize *                    # 2x: double-buffer
                         ((L_ps + S_ps) * E_ps + (L_pn + S_pn) * E_pn))
    cb = _pick_channel_block(channel, per_channel_bytes, vmem_input_budget_bytes)
    n_cb = channel // cb
    Gb = cb * H                                                   # per-step batch depth

    # Lane-dense output minors (>=128); wrapper slices the pad off.
    Sp_ps = _round_up(max(S_ps, _LANES), _LANES)
    Sp_pn = _round_up(max(S_pn, _LANES), _LANES)

    def kernel(qps_ref, kps_ref, qpn_ref, kpn_ref, ops_ref, opn_ref,
               acc_ps, acc_pn):
        c_idx = pl.program_id(1)

        @pl.when(c_idx == 0)
        def _init():
            acc_ps[...] = jnp.zeros_like(acc_ps)
            acc_pn[...] = jnp.zeros_like(acc_pn)

        def branch(q_ref, k_ref, acc_ref, scale, S):
            # Scale the smaller (G, L, E) tile, then cast to the MXU dtype.
            q = (q_ref[...] * scale).astype(compute_dtype)        # (Gb, L, E)
            k = k_ref[...].astype(compute_dtype)                  # (Gb, S, E)
            # Batched QK^T on the MXU; contraction handles trans_b, f32 accum.
            s = jnp.einsum('gle,gse->gls', q, k,
                           preferred_element_type=jnp.float32)    # (Gb, L, S)
            s = s - jnp.max(s, axis=-1, keepdims=True)
            e = jnp.exp(s)
            denom = jnp.sum(e, axis=-1, keepdims=True)            # (Gb, L, 1)
            # Channel-mean factor folded into the EUP reciprocal.
            p = e * pl.reciprocal(denom * float(channel), approx=True)
            # Partial channel mean for this channel block, per head.
            p = p.reshape(cb, H, p.shape[1], S)                   # leading-dim split
            acc_ref[...] += jnp.sum(p, axis=0)                    # (H, L, S)

        branch(qps_ref, kps_ref, acc_ps, scale_ps, S_ps)
        branch(qpn_ref, kpn_ref, acc_pn, scale_pn, S_pn)

        @pl.when(c_idx == n_cb - 1)
        def _store():
            # Single lane-dense (unmasked) store per output per (b) step.
            ops_ref[...] = _pad_minor(acc_ps[...], Sp_ps)
            opn_ref[...] = _pad_minor(acc_pn[...], Sp_pn)

    out_ps, out_pn = pl.pallas_call(
        kernel,
        out_shape=(
            jax.ShapeDtypeStruct((Bo, H, L_ps, Sp_ps), jnp.float32),
            jax.ShapeDtypeStruct((Bo, H, L_pn, Sp_pn), jnp.float32),
        ),
        grid_spec=pltpu.PrefetchScalarGridSpec(
            num_scalar_prefetch=0,
            grid=(Bo, n_cb),
            in_specs=[
                pl.BlockSpec((None, Gb, L_ps, E_ps), lambda b, c: (b, c, 0, 0)),
                pl.BlockSpec((None, Gb, S_ps, E_ps), lambda b, c: (b, c, 0, 0)),
                pl.BlockSpec((None, Gb, L_pn, E_pn), lambda b, c: (b, c, 0, 0)),
                pl.BlockSpec((None, Gb, S_pn, E_pn), lambda b, c: (b, c, 0, 0)),
            ],
            out_specs=[
                pl.BlockSpec((None, H, L_ps, Sp_ps), lambda b, c: (b, 0, 0, 0)),
                pl.BlockSpec((None, H, L_pn, Sp_pn), lambda b, c: (b, 0, 0, 0)),
            ],
            scratch_shapes=[
                pltpu.VMEM((H, L_ps, S_ps), jnp.float32),
                pltpu.VMEM((H, L_pn, S_pn), jnp.float32),
            ],
        ),
        compiler_params=pltpu.CompilerParams(
            dimension_semantics=("parallel", "arbitrary")),
    )(qps, kps, qpn, kpn)

    # Slice off the lane padding; this fuses with the downstream repeat/tile.
    return out_ps[..., :S_ps], out_pn[..., :S_pn]


class DACStructurePallas:
    """Pallas re-implementation of models/DCdetector.py::DAC_structure."""

    def __init__(self, win_size, patch_size, channel, mask_flag=True,
                 scale=None, attention_dropout=0.05, output_attention=False,
                 compute_dtype=jnp.bfloat16):
        self.scale = scale
        self.mask_flag = mask_flag                  # unused (as in PyTorch forward)
        self.output_attention = output_attention
        self.window_size = win_size
        self.patch_size = patch_size
        self.channel = channel
        self.attention_dropout = attention_dropout  # identity at eval
        self.compute_dtype = compute_dtype          # bf16 MXU operands by default

    def __call__(self, queries_patch_size, queries_patch_num,
                 keys_patch_size, keys_patch_num, values, patch_index,
                 attn_mask=None):
        E_ps = queries_patch_size.shape[-1]
        E_pn = queries_patch_num.shape[-1]
        # Match PyTorch exactly: `self.scale or 1/sqrt(E)` (scale=0.0 falls back).
        scale_ps = self.scale or 1.0 / math.sqrt(E_ps)
        scale_pn = self.scale or 1.0 / math.sqrt(E_pn)

        # Fused Pallas kernel: both branches, channel-mean done in-kernel.
        series_ps, series_pn = _dac_mean_attention(
            queries_patch_size, keys_patch_size,
            queries_patch_num, keys_patch_num,
            self.channel, scale_ps, scale_pn,
            compute_dtype=self.compute_dtype)

        p = self.patch_size[patch_index]
        r = self.window_size // p

        # einops repeat 'b l m n -> b l (m p) (n p)'  (element-wise repeat)
        series_ps = jnp.repeat(jnp.repeat(series_ps, p, axis=2), p, axis=3)
        # torch Tensor.repeat(1, 1, r, r)             (tile)
        series_pn = jnp.tile(series_pn, (1, 1, r, r))

        if self.output_attention:
            return series_ps, series_pn
        return None


def _reference(q_ps, q_pn, k_ps, k_pn, win_size, patch_size, channel,
               patch_index):
    """Pure-JAX reference following the PyTorch op order exactly."""
    def soft_attn(q, k):
        E = q.shape[-1]
        scale = 1.0 / math.sqrt(E)
        s = jnp.einsum('blhe,bshe->bhls', q, k) * scale
        return jax.nn.softmax(s, axis=-1)

    a_ps = soft_attn(q_ps, k_ps)          # (B*C, H, Lp, Lp)
    a_pn = soft_attn(q_pn, k_pn)          # (B*C, H, p, p)
    p = patch_size[patch_index]
    r = win_size // p
    a_ps = jnp.repeat(jnp.repeat(a_ps, p, axis=2), p, axis=3)
    a_pn = jnp.tile(a_pn, (1, 1, r, r))

    def chan_mean(x):
        BC = x.shape[0]
        return x.reshape(BC // channel, channel, *x.shape[1:]).mean(axis=1)

    return chan_mean(a_ps), chan_mean(a_pn)


if __name__ == "__main__":
    # Small, DCdetector-consistent shapes.
    win_size = 16
    patch_sizes = [2, 4]
    patch_index = 0
    p = patch_sizes[patch_index]          # 2
    channel = 4                           # feature channels folded into batch
    batch = 2
    heads = 2
    d_head = 8                            # E = d_model // heads

    BC = batch * channel
    L_ps = win_size // p                  # tokens in patch_size branch = 8
    L_pn = p                              # tokens in patch_num branch  = 2

    key = jax.random.PRNGKey(0)
    k1, k2, k3, k4, k5 = jax.random.split(key, 5)
    q_ps = jax.random.normal(k1, (BC, L_ps, heads, d_head), dtype=jnp.float32)
    k_ps = jax.random.normal(k2, (BC, L_ps, heads, d_head), dtype=jnp.float32)
    q_pn = jax.random.normal(k3, (BC, L_pn, heads, d_head), dtype=jnp.float32)
    k_pn = jax.random.normal(k4, (BC, L_pn, heads, d_head), dtype=jnp.float32)
    values = jax.random.normal(k5, (BC, win_size, heads, d_head),
                               dtype=jnp.float32)   # unused by forward

    ref_ps, ref_pn = _reference(q_ps, q_pn, k_ps, k_pn, win_size, patch_sizes,
                                channel, patch_index)

    # f32-compute path: error budget is only the EUP approx reciprocal.
    dac_f32 = DACStructurePallas(win_size, patch_sizes, channel,
                                 output_attention=True,
                                 compute_dtype=jnp.float32)
    ps_f32, pn_f32 = dac_f32(q_ps, q_pn, k_ps, k_pn, values, patch_index, None)
    jax.block_until_ready((ps_f32, pn_f32))
    assert ps_f32.shape == (batch, heads, win_size, win_size)
    assert pn_f32.shape == (batch, heads, win_size, win_size)
    assert np.allclose(np.asarray(ps_f32), np.asarray(ref_ps), atol=5e-3)
    assert np.allclose(np.asarray(pn_f32), np.asarray(ref_pn), atol=5e-3)

    # Default fast path: bf16 MXU operands (v5e/v6e throughput, halved Q/K DMA).
    # atol accounts for bf16 operand rounding on the scores plus the approx
    # reciprocal; softmax outputs are in [0, 1], structural bugs would be O(0.1+).
    dac_bf16 = DACStructurePallas(win_size, patch_sizes, channel,
                                  output_attention=True)
    ps_b, pn_b = dac_bf16(q_ps, q_pn, k_ps, k_pn, values, patch_index, None)
    jax.block_until_ready((ps_b, pn_b))
    assert ps_b.shape == (batch, heads, win_size, win_size)
    assert pn_b.shape == (batch, heads, win_size, win_size)
    assert np.allclose(np.asarray(ps_b), np.asarray(ref_ps), atol=2e-2)
    assert np.allclose(np.asarray(pn_b), np.asarray(ref_pn), atol=2e-2)

    print("KERNEL_OK")
</pallas_src>

<mosaic_0001>
module attributes {stable_mosaic.version = 11 : i64} {
  func.func @kernel(%arg0: i32, %arg1: i32, %arg2: memref<1x8x8x8xf32, #tpu.memory_space<vmem>>, %arg3: memref<1x8x8x8xf32, #tpu.memory_space<vmem>>, %arg4: memref<1x8x2x8xf32, #tpu.memory_space<vmem>>, %arg5: memref<1x8x2x8xf32, #tpu.memory_space<vmem>>, %arg6: memref<1x2x8x128xf32, #tpu.memory_space<vmem>>, %arg7: memref<1x2x2x128xf32, #tpu.memory_space<vmem>>, %arg8: memref<2x8x8xf32, #tpu.memory_space<vmem>>, %arg9: memref<2x2x2xf32, #tpu.memory_space<vmem>>) attributes {dimension_semantics = [#tpu.dimension_semantics<parallel>, #tpu.dimension_semantics<arbitrary>], iteration_bounds = array<i64: 2, 1>, scalar_prefetch = 0 : i64, scratch_operands = 2 : i64, tpu.core_type = #tpu.core_type<tc>, window_params = [{transform_indices = @transform_0, window_bounds = array<i64: 1, 8, 8, 8>}, {transform_indices = @transform_1, window_bounds = array<i64: 1, 8, 8, 8>}, {transform_indices = @transform_2, window_bounds = array<i64: 1, 8, 2, 8>}, {transform_indices = @transform_3, window_bounds = array<i64: 1, 8, 2, 8>}, {transform_indices = @transform_4, window_bounds = array<i64: 1, 2, 8, 128>}, {transform_indices = @transform_5, window_bounds = array<i64: 1, 2, 2, 128>}]} {
    %c0_i32 = arith.constant 0 : i32
    %0 = arith.cmpi eq, %arg1, %c0_i32 : i32
    %1 = arith.extui %0 : i1 to i32
    %c0_i32_0 = arith.constant 0 : i32
    %2 = arith.cmpi ne, %1, %c0_i32_0 : i32
    scf.if %2 {
      %cst_41 = arith.constant 0.000000e+00 : f32
      %54 = vector.broadcast %cst_41 : f32 to vector<2x8x8xf32>
      %c0_42 = arith.constant 0 : index
      %c0_43 = arith.constant 0 : index
      %c0_44 = arith.constant 0 : index
      %55 = vector.load %arg8[%c0_42, %c0_43, %c0_44] : memref<2x8x8xf32, #tpu.memory_space<vmem>>, vector<2x8x8xf32>
      tpu.vector_store %arg8[%c0_42, %c0_43, %c0_44], %54 {strides = array<i32>} : memref<2x8x8xf32, #tpu.memory_space<vmem>>, vector<2x8x8xf32>,
      %cst_45 = arith.constant 0.000000e+00 : f32
      %56 = vector.broadcast %cst_45 : f32 to vector<2x2x2xf32>
      %c0_46 = arith.constant 0 : index
      %c0_47 = arith.constant 0 : index
      %c0_48 = arith.constant 0 : index
      %57 = vector.load %arg9[%c0_46, %c0_47, %c0_48] : memref<2x2x2xf32, #tpu.memory_space<vmem>>, vector<2x2x2xf32>
      tpu.vector_store %arg9[%c0_46, %c0_47, %c0_48], %56 {strides = array<i32>} : memref<2x2x2xf32, #tpu.memory_space<vmem>>, vector<2x2x2xf32>,
    } else {
    }
    %c0 = arith.constant 0 : index
    %c0_1 = arith.constant 0 : index
    %c0_2 = arith.constant 0 : index
    %c0_3 = arith.constant 0 : index
    %3 = vector.load %arg2[%c0, %c0_1, %c0_2, %c0_3] : memref<1x8x8x8xf32, #tpu.memory_space<vmem>>, vector<1x8x8x8xf32>
    %4 = vector.shape_cast %3 : vector<1x8x8x8xf32> to vector<8x8x8xf32>
    %cst = arith.constant 0.353553385 : f32
    %5 = vector.broadcast %cst : f32 to vector<8x8x8xf32>
    %6 = arith.mulf %4, %5 : vector<8x8x8xf32>
    %c0_4 = arith.constant 0 : index
    %c0_5 = arith.constant 0 : index
    %c0_6 = arith.constant 0 : index
    %c0_7 = arith.constant 0 : index
    %7 = vector.load %arg3[%c0_4, %c0_5, %c0_6, %c0_7] : memref<1x8x8x8xf32, #tpu.memory_space<vmem>>, vector<1x8x8x8xf32>
    %8 = vector.shape_cast %7 : vector<1x8x8x8xf32> to vector<8x8x8xf32>
    "tpu.trace_start"() <{level = 10 : i32, message = "gle,gse->gls"}> : () -> ()
    %cst_8 = arith.constant dense<0.000000e+00> : vector<8x8x8xf32>
    %9 = tpu.matmul %6, %8, %cst_8 {dimension_numbers = #tpu.dot_dimension_numbers<[2], [2], [1], [1], [0, 0, 0, 1, 1, 1], [0], [0]>} : vector<8x8x8xf32>, vector<8x8x8xf32>, vector<8x8x8xf32> -> vector<8x8x8xf32>
    "tpu.trace_stop"() : () -> ()
    %cst_9 = arith.constant dense<0xFF800000> : vector<8x8xf32>
    %10 = vector.multi_reduction <maximumf>, %9, %cst_9 [2] : vector<8x8x8xf32> to vector<8x8xf32>
    %11 = vector.shape_cast %10 : vector<8x8xf32> to vector<8x8x1xf32>
    %12 = vector.broadcast %11 : vector<8x8x1xf32> to vector<8x8x8xf32>
    %13 = arith.subf %9, %12 : vector<8x8x8xf32>
    %14 = math.exp %13 : vector<8x8x8xf32>
    %cst_10 = arith.constant dense<0.000000e+00> : vector<8x8xf32>
    %15 = vector.multi_reduction <add>, %14, %cst_10 [2] : vector<8x8x8xf32> to vector<8x8xf32>
    %16 = vector.shape_cast %15 : vector<8x8xf32> to vector<8x8x1xf32>
    %cst_11 = arith.constant 4.000000e+00 : f32
    %17 = vector.broadcast %cst_11 : f32 to vector<8x8x1xf32>
    %18 = arith.mulf %16, %17 : vector<8x8x1xf32>
    %19 = tpu.reciprocal %18 {approx = true} : vector<8x8x1xf32> -> vector<8x8x1xf32>
    %20 = vector.broadcast %19 : vector<8x8x1xf32> to vector<8x8x8xf32>
    %21 = arith.mulf %14, %20 : vector<8x8x8xf32>
    %22 = vector.shape_cast %21 : vector<8x8x8xf32> to vector<4x2x8x8xf32>
    %c0_12 = arith.constant 0 : index
    %c0_13 = arith.constant 0 : index
    %c0_14 = arith.constant 0 : index
    %23 = vector.load %arg8[%c0_12, %c0_13, %c0_14] : memref<2x8x8xf32, #tpu.memory_space<vmem>>, vector<2x8x8xf32>
    %cst_15 = arith.constant dense<0.000000e+00> : vector<2x8x8xf32>
    %24 = vector.multi_reduction <add>, %22, %cst_15 [0] : vector<4x2x8x8xf32> to vector<2x8x8xf32>
    %25 = arith.addf %23, %24 : vector<2x8x8xf32>
    %c0_16 = arith.constant 0 : index
    %c0_17 = arith.constant 0 : index
    %c0_18 = arith.constant 0 : index
    %26 = vector.load %arg8[%c0_16, %c0_17, %c0_18] : memref<2x8x8xf32, #tpu.memory_space<vmem>>, vector<2x8x8xf32>
    tpu.vector_store %arg8[%c0_16, %c0_17, %c0_18], %25 {strides = array<i32>} : memref<2x8x8xf32, #tpu.memory_space<vmem>>, vector<2x8x8xf32>,
    %c0_19 = arith.constant 0 : index
    %c0_20 = arith.constant 0 : index
    %c0_21 = arith.constant 0 : index
    %c0_22 = arith.constant 0 : index
    %27 = vector.load %arg4[%c0_19, %c0_20, %c0_21, %c0_22] : memref<1x8x2x8xf32, #tpu.memory_space<vmem>>, vector<1x8x2x8xf32>
    %28 = vector.shape_cast %27 : vector<1x8x2x8xf32> to vector<8x2x8xf32>
    %cst_23 = arith.constant 0.353553385 : f32
    %29 = vector.broadcast %cst_23 : f32 to vector<8x2x8xf32>
    %30 = arith.mulf %28, %29 : vector<8x2x8xf32>
    %c0_24 = arith.constant 0 : index
    %c0_25 = arith.constant 0 : index
    %c0_26 = arith.constant 0 : index
    %c0_27 = arith.constant 0 : index
    %31 = vector.load %arg5[%c0_24, %c0_25, %c0_26, %c0_27] : memref<1x8x2x8xf32, #tpu.memory_space<vmem>>, vector<1x8x2x8xf32>
    %32 = vector.shape_cast %31 : vector<1x8x2x8xf32> to vector<8x2x8xf32>
    "tpu.trace_start"() <{level = 10 : i32, message = "gle,gse->gls"}> : () -> ()
    %cst_28 = arith.constant dense<0.000000e+00> : vector<8x2x2xf32>
    %33 = tpu.matmul %30, %32, %cst_28 {dimension_numbers = #tpu.dot_dimension_numbers<[2], [2], [1], [1], [0, 0, 0, 1, 1, 1], [0], [0]>} : vector<8x2x8xf32>, vector<8x2x8xf32>, vector<8x2x2xf32> -> vector<8x2x2xf32>
    "tpu.trace_stop"() : () -> ()
    %cst_29 = arith.constant dense<0xFF800000> : vector<8x2xf32>
    %34 = vector.multi_reduction <maximumf>, %33, %cst_29 [2] : vector<8x2x2xf32> to vector<8x2xf32>
    %35 = vector.shape_cast %34 : vector<8x2xf32> to vector<8x2x1xf32>
    %36 = vector.broadcast %35 : vector<8x2x1xf32> to vector<8x2x2xf32>
    %37 = arith.subf %33, %36 : vector<8x2x2xf32>
    %38 = math.exp %37 : vector<8x2x2xf32>
    %cst_30 = arith.constant dense<0.000000e+00> : vector<8x2xf32>
    %39 = vector.multi_reduction <add>, %38, %cst_30 [2] : vector<8x2x2xf32> to vector<8x2xf32>
    %40 = vector.shape_cast %39 : vector<8x2xf32> to vector<8x2x1xf32>
    %cst_31 = arith.constant 4.000000e+00 : f32
    %41 = vector.broadcast %cst_31 : f32 to vector<8x2x1xf32>
    %42 = arith.mulf %40, %41 : vector<8x2x1xf32>
    %43 = tpu.reciprocal %42 {approx = true} : vector<8x2x1xf32> -> vector<8x2x1xf32>
    %44 = vector.broadcast %43 : vector<8x2x1xf32> to vector<8x2x2xf32>
    %45 = arith.mulf %38, %44 : vector<8x2x2xf32>
    %46 = vector.shape_cast %45 : vector<8x2x2xf32> to vector<4x2x2x2xf32>
    %c0_32 = arith.constant 0 : index
    %c0_33 = arith.constant 0 : index
    %c0_34 = arith.constant 0 : index
    %47 = vector.load %arg9[%c0_32, %c0_33, %c0_34] : memref<2x2x2xf32, #tpu.memory_space<vmem>>, vector<2x2x2xf32>
    %cst_35 = arith.constant dense<0.000000e+00> : vector<2x2x2xf32>
    %48 = vector.multi_reduction <add>, %46, %cst_35 [0] : vector<4x2x2x2xf32> to vector<2x2x2xf32>
    %49 = arith.addf %47, %48 : vector<2x2x2xf32>
    %c0_36 = arith.constant 0 : index
    %c0_37 = arith.constant 0 : index
    %c0_38 = arith.constant 0 : index
    %50 = vector.load %arg9[%c0_36, %c0_37, %c0_38] : memref<2x2x2xf32, #tpu.memory_space<vmem>>, vector<2x2x2xf32>
    tpu.vector_store %arg9[%c0_36, %c0_37, %c0_38], %49 {strides = array<i32>} : memref<2x2x2xf32, #tpu.memory_space<vmem>>, vector<2x2x2xf32>,
    %c0_i32_39 = arith.constant 0 : i32
    %51 = arith.cmpi eq, %arg1, %c0_i32_39 : i32
    %52 = arith.extui %51 : i1 to i32
    %c0_i32_40 = arith.constant 0 : i32
    %53 = arith.cmpi ne, %52, %c0_i32_40 : i32
    scf.if %53 {
      %c0_41 = arith.constant 0 : index
      %c0_42 = arith.constant 0 : index
      %c0_43 = arith.constant 0 : index
      %54 = vector.load %arg8[%c0_41, %c0_42, %c0_43] : memref<2x8x8xf32, #tpu.memory_space<vmem>>, vector<2x8x8xf32>
      %cst_44 = arith.constant 0.000000e+00 : f32
      %55 = vector.broadcast %cst_44 : f32 to vector<2x8x120xf32>
      %56 = tpu.concatenate %54, %55 in 2 : vector<2x8x8xf32>, vector<2x8x120xf32> -> vector<2x8x128xf32>
      %c0_45 = arith.constant 0 : index
      %c0_46 = arith.constant 0 : index
      %c0_47 = arith.constant 0 : index
      %c0_48 = arith.constant 0 : index
      %57 = vector.load %arg6[%c0_45, %c0_46, %c0_47, %c0_48] : memref<1x2x8x128xf32, #tpu.memory_space<vmem>>, vector<1x2x8x128xf32>
      %58 = vector.shape_cast %57 : vector<1x2x8x128xf32> to vector<2x8x128xf32>
      %59 = vector.shape_cast %56 : vector<2x8x128xf32> to vector<1x2x8x128xf32>
      tpu.vector_store %arg6[%c0_45, %c0_46, %c0_47, %c0_48], %59 {strides = array<i32>} : memref<1x2x8x128xf32, #tpu.memory_space<vmem>>, vector<1x2x8x128xf32>,
      %c0_49 = arith.constant 0 : index
      %c0_50 = arith.constant 0 : index
      %c0_51 = arith.constant 0 : index
      %60 = vector.load %arg9[%c0_49, %c0_50, %c0_51] : memref<2x2x2xf32, #tpu.memory_space<vmem>>, vector<2x2x2xf32>
      %cst_52 = arith.constant 0.000000e+00 : f32
      %61 = vector.broadcast %cst_52 : f32 to vector<2x2x126xf32>
      %62 = tpu.concatenate %60, %61 in 2 : vector<2x2x2xf32>, vector<2x2x126xf32> -> vector<2x2x128xf32>
      %c0_53 = arith.constant 0 : index
      %c0_54 = arith.constant 0 : index
      %c0_55 = arith.constant 0 : index
      %c0_56 = arith.constant 0 : index
      %63 = vector.load %arg7[%c0_53, %c0_54, %c0_55, %c0_56] : memref<1x2x2x128xf32, #tpu.memory_space<vmem>>, vector<1x2x2x128xf32>
      %64 = vector.shape_cast %63 : vector<1x2x2x128xf32> to vector<2x2x128xf32>
      %65 = vector.shape_cast %62 : vector<2x2x128xf32> to vector<1x2x2x128xf32>
      tpu.vector_store %arg7[%c0_53, %c0_54, %c0_55, %c0_56], %65 {strides = array<i32>} : memref<1x2x2x128xf32, #tpu.memory_space<vmem>>, vector<1x2x2x128xf32>,
    } else {
    }
    return
  }
  func.func @transform_0(%arg0: i32, %arg1: i32) -> (i32, i32, i32, i32) {
    %c0_i32 = arith.constant 0 : i32
    %c0_i32_0 = arith.constant 0 : i32
    %c0_i32_1 = arith.constant 0 : i32
    return %arg0, %arg1, %c0_i32, %c0_i32_0 : i32, i32, i32, i32
  }
  func.func @transform_1(%arg0: i32, %arg1: i32) -> (i32, i32, i32, i32) {
    %c0_i32 = arith.constant 0 : i32
    %c0_i32_0 = arith.constant 0 : i32
    %c0_i32_1 = arith.constant 0 : i32
    return %arg0, %arg1, %c0_i32, %c0_i32_0 : i32, i32, i32, i32
  }
  func.func @transform_2(%arg0: i32, %arg1: i32) -> (i32, i32, i32, i32) {
    %c0_i32 = arith.constant 0 : i32
    %c0_i32_0 = arith.constant 0 : i32
    %c0_i32_1 = arith.constant 0 : i32
    return %arg0, %arg1, %c0_i32, %c0_i32_0 : i32, i32, i32, i32
  }
  func.func @transform_3(%arg0: i32, %arg1: i32) -> (i32, i32, i32, i32) {
    %c0_i32 = arith.constant 0 : i32
    %c0_i32_0 = arith.constant 0 : i32
    %c0_i32_1 = arith.constant 0 : i32
    return %arg0, %arg1, %c0_i32, %c0_i32_0 : i32, i32, i32, i32
  }
  func.func @transform_4(%arg0: i32, %arg1: i32) -> (i32, i32, i32, i32) {
    %c0_i32 = arith.constant 0 : i32
    %c0_i32_0 = arith.constant 0 : i32
    %c0_i32_1 = arith.constant 0 : i32
    %c0_i32_2 = arith.constant 0 : i32
    return %arg0, %c0_i32, %c0_i32_0, %c0_i32_1 : i32, i32, i32, i32
  }
  func.func @transform_5(%arg0: i32, %arg1: i32) -> (i32, i32, i32, i32) {
    %c0_i32 = arith.constant 0 : i32
    %c0_i32_0 = arith.constant 0 : i32
    %c0_i32_1 = arith.constant 0 : i32
    %c0_i32_2 = arith.constant 0 : i32
    return %arg0, %c0_i32, %c0_i32_0, %c0_i32_1 : i32, i32, i32, i32
  }
}

</mosaic_0001>

<bundles_post_ra>
// kernel: tpu_custom_call.1
= control target key start
LH: loop header
LB: loop body
LE: loop exit
PB: predicated region body
PF: predicated region fallthrough
CT: control target
= control target key end

     0   :  { %s2331_s0 = inlined_call_operand.hbm [shape: f32[2,8,8,8], index: 0, kind: input, shape index: {}]   ;;  %s2332_s1 = inlined_call_operand.hbm [shape: f32[2,8,8,8], index: 1, kind: input, shape index: {}]   ;;  %s2333_s2 = inlined_call_operand.hbm [shape: f32[2,8,2,8], index: 2, kind: input, shape index: {}]   ;;  %s2334_s3 = inlined_call_operand.hbm [shape: f32[2,8,2,8], index: 3, kind: input, shape index: {}]   ;;  %s2335_s4 = inlined_call_operand.hbm [shape: f32[2,2,8,128], index: 4, kind: output, shape index: {0}]   ;;  %s2336_s5 = inlined_call_operand.hbm [shape: f32[2,2,2,128], index: 5, kind: output, shape index: {1}]  }
   0x1   :  { %2343 = sst [smem:[#allocation26_spill]] %s2331_s0 }
   0x2   :  { %2344 = sst [smem:[#allocation27_spill]] %s2332_s1 }
   0x3   :  { %11 = vsyncpa [#allocation5], 0 }
   0x4   :  { %13 = vsyncpa [#allocation5 + $0x1], 0 }
   0x5   :  { %14 = vsyncpa [#allocation8], 0 }
   0x6   :  { %16 = vsyncpa [#allocation8 + $0x1], 0 }
   0x7   :  { %17 = vsyncpa [#allocation11], 0 }
   0x8   :  { %19 = vsyncpa [#allocation11 + $0x1], 0 }
   0x9   :  { %20 = vsyncpa [#allocation6], 0 }
   0xa   :  { %22 = vsyncpa [#allocation6 + $0x1], 0 }
   0xb   :  { %23 = vsyncpa [#allocation14], 0 }
   0xc   :  { %25 = vsyncpa [#allocation14 + $0x1], 0  ;;  %s1872_s18 = smov 0   ;;  %s1874_s19 = smov 0  }
   0xd   :  { %s1876_s20 = smov 0   ;;  %s1878_s21 = smov 0  }
   0xe   :  { %s1880_s22 = smov 0   ;;  %s1882_s23 = smov 0  }
   0xf LB: > { %2345 = sst [smem:[#allocation20_spill]] %s1811_s18  ;;  %s1903_s24 = sadd.s32 4294967295, %s1831_s23   ;;  %s1831_s23 = sphi %s1882_s23, %s31_s23   ;;  %s1827_s22 = sphi %s1880_s22, %s2368_s22   ;;  %s1823_s21 = sphi %s1878_s21, %s2367_s21   ;;  %s1819_s20 = sphi %s1876_s20, %s2363_s20   ;;  %s1815_s19 = sphi %s1874_s19, %s2366_s19   ;;  %s1811_s18 = sphi %s1872_s18, %s2365_s18  }
  0x10   : > { %2346 = sst [smem:[#allocation21_spill]] %s1819_s20  ;;  %s1366_s25 = sadd.s32 4294967294, %s1831_s23  }
  0x11   : > { %2347 = sst [smem:[#allocation22_spill]] %s1831_s23  ;;  %s43_s26 = sadd.s32 1, %s1827_s22 }
  0x12   : > { %s52_s27 = sadd.s32 1, %s1819_s20  ;;  %p45_p0 = scmp.ge.s32.totalorder %s43_s26, 2 }
  0x13   : > { %p59_p1 = scmp.ne.s32.totalorder %s1819_s20, %s1815_s19  ;;  %p60_p2 = scmp.eq.s32.totalorder %s1831_s23, 0 }
  0x14   : > { %p65_p3 = scmp.ne.s32.totalorder %s1815_s19, %s1811_s18  ;;  %s2370_s26 = smov (%p45_p0, %s43_s26), 0 }
  0x15   : > { %2348 = sst [smem:[#allocation23_spill]] %s2370_s26  ;;  %p1915_p4 = por %p60_p2, %p59_p1 }
  0x16   : > { %p66_p5 = scmp.eq.s32.totalorder %s1903_s24, 0  ;;  %s47_s29 = ssub.s32 %s1827_s22, %s2370_s26 }
  0x17   : > { %p173_p6 = scmp.eq.s32.totalorder %s1903_s24, 1  ;;  %p50_p7 = scmp.eq.s32.totalorder %s47_s29, 0 }
  0x18   : > { %p1923_p8 = por %p66_p5, %p65_p3  ;;  %p179_p10 = scmp.eq.s32.totalorder %s1366_s25, 1 }
  0x19   : > { %p1927_p9 = por %p173_p6, %p59_p1  ;;  %p1368_p12 = scmp.ge.s32.totalorder %s1831_s23, 2 }
  0x1a   : > { %s1932_s7 = scalar_select %p50_p7, %s1819_s20, %s52_s27  }
  0x1b   : > { %p1934_p11 = por %p179_p10, %p65_p3  ;;  %p1466_p13 = scmp.lt.s32.totalorder %s1831_s23, 2 }
  0x1c   : > { %2352 = sst [smem:[#allocation24_spill]] %s1932_s7  ;;  %s1941_s9 = sand.u32 1, %s1819_s20  }
  0x1d   : > { %s2353_s8 = scalar_select %p1934_p11, 1, 0 }
  0x1e   : > { %s1369_s10 = sshll.u32 %s1941_s9, 6  ;;  %s1428_s11 = sshll.u32 %s1827_s22, 6 }
  0x1f   : > { %2354 = sst [smem:[#allocation25_spill]] %s2353_s8  ;;  %p1947_p0 = pnand %p1466_p13, %p1915_p4 }
  0x20   : > { %s249_s13 = sand.u32 1, %s1831_s23   ;;  %s2356_s1 = sld [smem:[#allocation27_spill]] }
  0x21   : > { %s253_s25 = scalar_lea.vmem [#allocation7], %s1369_s10  ;;  %s1955_s29 = scalar_lea.sflag [#allocation8], %s249_s13 }
  0x22   : > { %s263_s27 = sshll.u32 %s253_s25, 4  ;;  %s1833_s28 = smov 128   ;;  %s264_s27 = int_to_ptr.vmem [resolvable:$true] %s263_s27 }
  0x23   : > { %s1834_s26 = smov 8   ;;  %p1381_p1 = scmp.ge.s32.totalorder %s1831_s23, 1 }
  0x24   : > { %p319_p2 = scmp.lt.s32.totalorder %s1831_s23, 3  ;;  %s2358_s0 = sld [smem:[#allocation26_spill]] }
  0x25   : > { %s229_s7 = scalar_lea.vmem [#allocation4], %s1369_s10  ;;  %s226_s20 = scalar_lea.sflag [#allocation5], %s1941_s9 }
  0x26   : > { %s260_s16 = scalar_lea.hbm %s2356_s1, %s1428_s11  ;;  %p1962_p3 = pnand %p1381_p1, %p319_p2 }
  0x27   : > { %s261_s17 = sshll.u32 %s260_s16, 4  ;;  %s239_s13 = sshll.u32 %s229_s7, 4  ;;  %s262_s17 = int_to_ptr.hbm [resolvable:$true] %s261_s17  ;;  %s240_s13 = int_to_ptr.vmem [resolvable:$true] %s239_s13 }
  0x28   : > { %1452 = dma.hbm_to_vmem [thread:$0]  (!%p1947_p0), %s262_s17, 1024, %s264_s27, %s1955_s29, %s1833_s28, %s1833_s28, %s1834_s26  }
  0x29   : > { %s1375_s17 = sshll.u32 %s1941_s9, 4  ;;  %s1430_s27 = sshll.u32 %s1827_s22, 4 }
  0x2a   : > { %s236_s25 = scalar_lea.hbm %s2358_s0, %s1428_s11  ;;  %s284_s18 = scalar_lea.hbm %s2333_s2, %s1430_s27 }
  0x2b   : > { %s237_s1 = sshll.u32 %s236_s25, 4  ;;  %s285_s15 = sshll.u32 %s284_s18, 4  ;;  %s238_s1 = int_to_ptr.hbm [resolvable:$true] %s237_s1  ;;  %s286_s15 = int_to_ptr.hbm [resolvable:$true] %s285_s15 }
  0x2c   : > { %1449 = dma.hbm_to_vmem [thread:$0]  (!%p1947_p0), %s238_s1, 1024, %s240_s13, %s226_s20, %s1833_s28, %s1833_s28, %s1834_s26  }
  0x2d   : > { %s277_s11 = scalar_lea.vmem [#allocation9], %s1375_s17  ;;  %s1835_s10 = smov 32  }
  0x2e   : > { %s287_s16 = sshll.u32 %s277_s11, 4  ;;  %s1836_s7 = smov 2   ;;  %s288_s16 = int_to_ptr.vmem [resolvable:$true] %s287_s16 }
  0x2f   : > { %1455 = dma.hbm_to_vmem [thread:$0]  (!%p1947_p0), %s286_s15, 256, %s288_s16, %s1955_s29, %s1835_s10, %s1835_s10, %s1836_s7  }
  0x30   : > { %s308_s1 = scalar_lea.hbm %s2334_s3, %s1430_s27  ;;  %s301_s20 = scalar_lea.vmem [#allocation10], %s1375_s17 }
  0x31   : > { %s311_s26 = sshll.u32 %s301_s20, 4  ;;  %s309_s28 = sshll.u32 %s308_s1, 4  ;;  %s312_s26 = int_to_ptr.vmem [resolvable:$true] %s311_s26  ;;  %s310_s28 = int_to_ptr.hbm [resolvable:$true] %s309_s28 }
  0x32   : > { %s298_s23 = scalar_lea.sflag [#allocation11], %s1941_s9  ;;  %323 = sbr.rel (%p1962_p3) target bundleno = 521 (0x209), region = 36 }
  0x33   : > { %1458 = dma.hbm_to_vmem [thread:$0]  (!%p1947_p0), %s310_s28, 256, %s312_s26, %s298_s23, %s1835_s10, %s1835_s10, %s1836_s7  }
  0x34   : > { %s1989_s18 = sand.u32 (!%p1962_p3), 1, %s1815_s19  }
  0x35   : > { %s1382_s8 = sshll.u32 (!%p1962_p3), %s1989_s18, 6  ;;  %s326_s0 = scalar_lea.sflag (!%p1962_p3), [#allocation5], %s1989_s18 }
  0x36   : > { %s1993_s29 = scalar_lea.vmem (!%p1962_p3), [#allocation4], %s1382_s8 }
  0x37   : > { %1790 = dma.done.wait (%p1923_p8), %s326_s0, 1024  }
  0x38   : > { %1792 = vsyncadd (%p1923_p8), %s326_s0, 4294966272  ;;  %s335_s9 = sand.u32 1, %s1903_s24   ;;  %s2000_s14 = scalar_lea.vmem [#allocation7], %s1382_s8 }
  0x39   : > { %s336_s12 = scalar_lea.sflag [#allocation8], %s335_s9 }
  0x3a   : > { %1794 = dma.done.wait (%p1923_p8), %s336_s12, 1280  }
  0x3b   : > { %1796 = vsyncadd (%p1923_p8), %s336_s12, 4294966016  ;;  %s2007_s13 = sshll.u32 %s1989_s18, 4  ;;  %s356_s27 = scalar_lea.sflag [#allocation11], %s1989_s18 }
  0x3c   : > { %s2010_s17 = scalar_lea.vmem [#allocation9], %s2007_s13  ;;  %s2014_s15 = scalar_lea.vmem [#allocation10], %s2007_s13 }
  0x3d   : > { %1798 = dma.done.wait (%p1923_p8), %s356_s27, 256  }
  0x3e   : > { %1800 = vsyncadd (%p1923_p8), %s356_s27, 4294967040  ;;  %vm415_vm0 = vcmask 64512   ;;  %v437_v0 = vld [vmem:[%s2000_s14] sm:$0xff]  ;;  %v439_v1 = vld [vmem:[%s2000_s14 + $0x10] sm:$0xff]  ;;  %vm418_vm1 = vcmask 9216   ;;  %s2246_s24 = scalar_lea.vmem [#allocation12], %s2007_s13 }
  0x3f   : > { %v440_v2 = vld [vmem:[%s2000_s14 + $0x18] sm:$0xff]  ;;  %1388 = vmatpush.xpose.msk.msra.mxu0 %vm415_vm0, %v437_v0  ;;  %1392 = vmatpush.xpose.msk.msra.mxu2 %vm415_vm0, %v439_v1  ;;  %v421_v3 = vld [vmem:[%s1993_s29] sm:$0xff]  ;;  %v423_v4 = vld [vmem:[%s1993_s29 + $0x10] sm:$0xff]  ;;  %s1432_s30 = sshll.u32 %s1823_s21, 4  ;;  %s1433_s7 = sshll.u32 %s1823_s21, 2  ;;  %vm1130_vm2 = vcmask 15360  }
  0x40   : > { %v424_v5 = vld [vmem:[%s1993_s29 + $0x18] sm:$0xff]  ;;  %1394 = vmatpush.xpose.msk.msra.mxu3 %vm415_vm0, %v440_v2  ;;  %v429_v6 = vmul.f32 0.35355338, %v421_v3  ;;  %v431_v7 = vmul.f32 0.35355338, %v423_v4  ;;  %v438_v9 = vld [vmem:[%s2000_s14 + $0x8] sm:$0xff]  ;;  %s1152_s10 = scalar_lea.hbm %s2335_s4, %s1432_s30  ;;  %s1169_s23 = scalar_lea.hbm %s2336_s5, %s1433_s7 }
  0x41   : > { %v432_v8 = vmul.f32 0.35355338, %v424_v5  ;;  %v441_v10 = vld [vmem:[%s2000_s14 + $0x20] sm:$0xff]  ;;  %v444_v11 = vld [vmem:[%s2000_s14 + $0x38] sm:$0xff]  ;;  %v422_v12 = vld [vmem:[%s1993_s29 + $0x8] sm:$0xff]  ;;  %1390 = vmatpush.xpose.msk.msra.mxu1 %vm415_vm0, %v438_v9  ;;  %s1153_s25 = sshll.u32 %s2246_s24, 4  ;;  %s2263_s25 = int_to_ptr.vmem [resolvable:$true] %s1153_s25 }
  0x42   : > { %1389 = vmatmul.msk.f32.vlgmr.msra.gmra.mxu0 %vm415_vm0, %v429_v6  ;;  %1393 = vmatmul.msk.f32.vlgmr.msra.gmra.mxu2 %vm415_vm0, %v431_v7  ;;  %v430_v13 = vmul.f32 0.35355338, %v422_v12  ;;  %v425_v14 = vld [vmem:[%s1993_s29 + $0x20] sm:$0xff]  ;;  %v428_v15 = vld [vmem:[%s1993_s29 + $0x38] sm:$0xff]  ;;  %v442_v16 = vld [vmem:[%s2000_s14 + $0x28] sm:$0xff]  ;;  %s1387_s1 = sshll.u32 %s1989_s18, 2 }
  0x43   : > { %1395 = vmatmul.msk.f32.vlgmr.msra.gmra.mxu3 %vm415_vm0, %v432_v8  ;;  %1396 = vmatpush.xpose.msk.msrb.mxu0 %vm415_vm0, %v441_v10  ;;  %v786_v17 = vld [vmem:[%s2014_s15] sm:$0x3]  ;;  %v789_v18 = vld [vmem:[%s2014_s15 + $0x6] sm:$0x3]  ;;  %v433_v20 = vmul.f32 0.35355338, %v425_v14 }
  0x44   : > { %1402 = vmatpush.xpose.msk.msrb.mxu3 %vm415_vm0, %v444_v11  ;;  %v443_v19 = vld [vmem:[%s2000_s14 + $0x30] sm:$0xff]  ;;  %1391 = vmatmul.msk.f32.vlgmr.msra.gmra.mxu1 %vm415_vm0, %v430_v13  ;;  %v436_v21 = vmul.f32 0.35355338, %v428_v15  ;;  %v426_v22 = vld [vmem:[%s1993_s29 + $0x28] sm:$0xff]  ;;  %s1155_s20 = sshll.u32 %s1152_s10, 4  ;;  %s2267_s8 = scalar_lea.vmem [#allocation13], %s1387_s1  ;;  %s2265_s20 = int_to_ptr.hbm [resolvable:$true] %s1155_s20 }
  0x45   : > { %1398 = vmatpush.xpose.msk.msrb.mxu1 %vm415_vm0, %v442_v16  ;;  %1400 = vmatpush.xpose.msk.msrb.mxu2 %vm415_vm0, %v443_v19  ;;  %v427_v23 = vld [vmem:[%s1993_s29 + $0x30] sm:$0xff]  ;;  %v790_v27 = vld [vmem:[%s2014_s15 + $0x8] sm:$0x3]  ;;  %v434_v28 = vmul.f32 0.35355338, %v426_v22  ;;  %s1170_s21 = sshll.u32 %s2267_s8, 4  ;;  %s2273_s21 = int_to_ptr.vmem [resolvable:$true] %s1170_s21 }
  0x46   : > { %v787_v24 = vld [vmem:[%s2014_s15 + $0x2] sm:$0x3]  ;;  %v435_v25 = vmul.f32 0.35355338, %v427_v23  ;;  %v788_v26 = vld [vmem:[%s2014_s15 + $0x4] sm:$0x3] }
  0x47   : > { %1404 = vmatpush.xpose.msk.msra.mxu0 %vm415_vm0, %v786_v17  ;;  %v770_v29 = vld [vmem:[%s2010_s17] sm:$0x3]  ;;  %v772_v30 = vld [vmem:[%s2010_s17 + $0x4] sm:$0x3]  ;;  %v792_v31 = vld [vmem:[%s2014_s15 + $0xc] sm:$0x3] }
  0x48   : > { %1410 = vmatpush.xpose.msk.msra.mxu3 %vm415_vm0, %v789_v18  ;;  %v793_v32 = vld [vmem:[%s2014_s15 + $0xe] sm:$0x3]  ;;  %v773_v33 = vld [vmem:[%s2010_s17 + $0x6] sm:$0x3]  ;;  %v791_v34 = vld [vmem:[%s2014_s15 + $0xa] sm:$0x3] }
  0x49   : > { %1406 = vmatpush.xpose.msk.msra.mxu1 %vm415_vm0, %v787_v24  ;;  %1408 = vmatpush.xpose.msk.msra.mxu2 %vm415_vm0, %v788_v26  ;;  %v778_v35 = vmul.f32 0.35355338, %v770_v29  ;;  %v780_v36 = vmul.f32 0.35355338, %v772_v30  ;;  %v781_v37 = vmul.f32 0.35355338, %v773_v33 }
  0x4a   : > { %1397 = vmatmul.msk.f32.vlgmr.msrb.gmra.mxu0 %vm415_vm0, %v433_v20  ;;  %1401 = vmatmul.msk.f32.vlgmr.msrb.gmra.mxu2 %vm415_vm0, %v435_v25  ;;  %v771_v38 = vld [vmem:[%s2010_s17 + $0x2] sm:$0x3]  ;;  %v774_v40 = vld [vmem:[%s2010_s17 + $0x8] sm:$0x3]  ;;  %v776_v41 = vld [vmem:[%s2010_s17 + $0xc] sm:$0x3] }
  0x4b   : > { %1403 = vmatmul.msk.f32.vlgmr.msrb.gmra.mxu3 %vm415_vm0, %v436_v21  ;;  %1412 = vmatpush.xpose.msk.msrb.mxu0 %vm415_vm0, %v790_v27  ;;  %v779_v39 = vmul.f32 0.35355338, %v771_v38  ;;  %v777_v42 = vld [vmem:[%s2010_s17 + $0xe] sm:$0x3]  ;;  %v782_v43 = vmul.f32 0.35355338, %v774_v40 }
  0x4c   : > { %1418 = vmatpush.xpose.msk.msrb.mxu3 %vm415_vm0, %v793_v32  ;;  %1399 = vmatmul.msk.f32.vlgmr.msrb.gmra.mxu1 %vm415_vm0, %v434_v28  ;;  %v784_v44 = vmul.f32 0.35355338, %v776_v41  ;;  %v775_v45 = vld [vmem:[%s2010_s17 + $0xa] sm:$0x3]  ;;  %v785_v46 = vmul.f32 0.35355338, %v777_v42 }
  0x4d   : > { %1416 = vmatpush.xpose.msk.msrb.mxu2 %vm415_vm0, %v792_v31  ;;  %1414 = vmatpush.xpose.msk.msrb.mxu1 %vm415_vm0, %v791_v34  ;;  %v783_v47 = vmul.f32 0.35355338, %v775_v45  ;;  %s1172_s0 = sshll.u32 %s1169_s23, 4  ;;  %s1136_s29 = scalar_lea.sflag [#allocation6], %s1989_s18  ;;  %s2276_s0 = int_to_ptr.hbm [resolvable:$true] %s1172_s0 }
  0x4e   : > { %s1723_s9 = sshra.s32 %s2265_s20, 4  ;;  %s1729_s17 = scalar_lea.hbm %s2335_s4, 32  ;;  %s1724_s9 = int_to_ptr.hbm [resolvable:$true] %s1723_s9 }
  0x4f   : > { %s1725_s12 = scalar_lea.hbm %s1724_s9, 16  ;;  %p1730_p7 = scmp.lt.s32.totalorder %s1724_s9, %s2335_s4 }
  0x50   : > { %p1726_p4 = scmp.ne.s32.totalorder %s1724_s9, %s1725_s12  ;;  %p1731_p8 = scmp.lt.s32.totalorder %s1729_s17, %s1725_s12 }
  0x52   : > { %1405 = vmatmul.msk.f32.vlgmr.msra.gmra.mxu0 %vm415_vm0, %v778_v35  ;;  %1409 = vmatmul.msk.f32.vlgmr.msra.gmra.mxu2 %vm415_vm0, %v780_v36  ;;  %p1727_p5 = pnand %p1726_p4, %p1927_p9  ;;  %p1732_p10 = por %p1731_p8, %p1730_p7 }
  0x53   : > { %1411 = vmatmul.msk.f32.vlgmr.msra.gmra.mxu3 %vm415_vm0, %v781_v37 }
  0x54   : > { %1407 = vmatmul.msk.f32.vlgmr.msra.gmra.mxu1 %vm415_vm0, %v779_v39  ;;  %p1728_p6 = pneg %p1727_p5 }
  0x56   : > { %p1733_p13 = pnand %p1732_p10, %p1728_p6 }
  0x5a   : > { %1413 = vmatmul.msk.f32.vlgmr.msrb.gmra.mxu0 %vm415_vm0, %v782_v43  ;;  %1417 = vmatmul.msk.f32.vlgmr.msrb.gmra.mxu2 %vm415_vm0, %v784_v44 }
  0x5b   : > { %1419 = vmatmul.msk.f32.vlgmr.msrb.gmra.mxu3 %vm415_vm0, %v785_v46 }
  0x5c   : > { %1415 = vmatmul.msk.f32.vlgmr.msrb.gmra.mxu1 %vm415_vm0, %v783_v47 }
  0xbf   : > { %v469_v48 = vpop.f32.mrf.mxu0 }
  0xc0   : > { %v654_v49 = vsel %vm415_vm0, %v469_v48, -inf }
  0xc1   : > { %655 = vmax.xlane.f32.xlu0 %v654_v49  ;;  %v495_v50 = vpop.f32.mrf.mxu1 }
  0xc2   : > { %v657_v54 = vsel %vm415_vm0, %v495_v50, -inf }
  0xc5   : > { %v521_v51 = vpop.f32.mrf.mxu2 }
  0xc6   : > { %v2085_v52 = vpop.f32.mrf.mxu3  ;;  %v660_v53 = vsel %vm415_vm0, %v521_v51, -inf }
  0xc7   : > { %661 = vmax.xlane.f32.xlu1 %v660_v53  ;;  %v573_v55 = vpop.f32.mrf.mxu0  ;;  %v663_v58 = vsel %vm415_vm0, %v2085_v52, -inf }
  0xc8   : > { %v666_v56 = vsel %vm415_vm0, %v573_v55, -inf }
  0xc9   : > { %658 = vmax.xlane.f32.xlu0 %v657_v54  ;;  %667 = vmax.xlane.f32.xlu2 %v666_v56  ;;  %v2090_v57 = vpop.f32.mrf.mxu1 }
  0xca   : > { %v669_v60 = vsel %vm415_vm0, %v2090_v57, -inf }
  0xcd   : > { %v2098_v62 = vpop.f32.mrf.mxu2 }
  0xce   : > { %v2094_v59 = vpop.f32.mrf.mxu3  ;;  %v672_v2 = vsel %vm415_vm0, %v2098_v62, -inf }
  0xcf   : > { %664 = vmax.xlane.f32.xlu1 %v663_v58  ;;  %v817_v61 = vpop.f32.mrf.mxu0  ;;  %v675_v15 = vsel %vm415_vm0, %v2094_v59, -inf }
  0xd0   : > { %v1003_v63 = vsel %vm418_vm1, %v817_v61, -inf }
  0xd1   : > { %670 = vmax.xlane.f32.xlu0 %v669_v60  ;;  %1004 = vmax.xlane.f32.xlu2 %v1003_v63  ;;  %v2101_v0 = vpop.f32.mrf.mxu1 }
  0xd2   : > { %v1006_v3 = vsel %vm418_vm1, %v2101_v0, -inf }
  0xd5   : > { %v2111_v5 = vpop.f32.mrf.mxu2 }
  0xd6   : > { %v2103_v1 = vpop.f32.mrf.mxu3  ;;  %v1009_v9 = vsel %vm418_vm1, %v2111_v5, -inf }
  0xd7   : > { %v1012_v4 = vsel %vm418_vm1, %v2103_v1, -inf  ;;  %v2113_v6 = vpop.f32.mrf.mxu0 }
  0xd8   : > { %1013 = vmax.xlane.f32.xlu1 %v1012_v4  ;;  %v1015_v8 = vsel %vm418_vm1, %v2113_v6, -inf }
  0xd9   : > { %673 = vmax.xlane.f32.xlu0 %v672_v2  ;;  %1007 = vmax.xlane.f32.xlu2 %v1006_v3  ;;  %v2115_v7 = vpop.f32.mrf.mxu1 }
  0xda   : > { %v1018_v10 = vsel %vm418_vm1, %v2115_v7, -inf }
  0xdd   : > { %v2123_v11 = vpop.f32.mrf.mxu2 }
  0xde   : > { %v2125_v12 = vpop.f32.mrf.mxu3  ;;  %v1021_v14 = vsel %vm418_vm1, %v2123_v11, -inf }
  0xdf   : > { %v1024_v13 = vsel %vm418_vm1, %v2125_v12, -inf }
  0xe0   : > { %1016 = vmax.xlane.f32.xlu1 %v1015_v8 }
  0xe1   : > { %1010 = vmax.xlane.f32.xlu0 %v1009_v9  ;;  %1019 = vmax.xlane.f32.xlu2 %v1018_v10 }
  0xe8   : > { %676 = vmax.xlane.f32.xlu1 %v675_v15 }
  0xe9   : > { %1025 = vmax.xlane.f32.xlu0 %v1024_v13  ;;  %1022 = vmax.xlane.f32.xlu2 %v1021_v14 }
 0x134   : > { %v656_v16 = vpop.xlane.xlu0 %655 }
 0x135   : > { %v678_v17 = vsub.f32 %v469_v48, %v656_v16 }
 0x137   : > { %v686_v18 = vmul.f32 1.442695, %v678_v17 }
 0x139   : > { %1525 = vpow2.f32 %v686_v18 }
 0x13a   : > { %v662_v19 = vpop.xlane.xlu1 %661 }
 0x13b   : > { %v680_v20 = vsub.f32 %v521_v51, %v662_v19 }
 0x13c   : > { %v659_v21 = vpop.xlane.xlu0 %658  ;;  %v668_v22 = vpop.xlane.xlu2 %667 }
 0x13d   : > { %v690_v23 = vmul.f32 1.442695, %v680_v20  ;;  %v679_v24 = vsub.f32 %v495_v50, %v659_v21  ;;  %v682_v25 = vsub.f32 %v573_v55, %v668_v22 }
 0x13f   : > { %v2133_v26 = vpop.eup %1525  ;;  %1527 = vpow2.f32 %v690_v23  ;;  %v688_v27 = vmul.f32 1.442695, %v679_v24  ;;  %v694_v29 = vmul.f32 1.442695, %v682_v25 }
 0x140   : > { %v702_v28 = vsel %vm415_vm0, %v2133_v26, 0.0 }
 0x141   : > { %1529 = vpow2.f32 %v688_v27  ;;  %703 = vadd.xlane.f32.xlu1 %v702_v28 }
 0x142   : > { %v665_v30 = vpop.xlane.xlu1 %664  ;;  %1531 = vpow2.f32 %v694_v29 }
 0x143   : > { %v681_v31 = vsub.f32 %v2085_v52, %v665_v30 }
 0x144   : > { %v671_v32 = vpop.xlane.xlu0 %670  ;;  %v1005_v33 = vpop.xlane.xlu2 %1004 }
 0x145   : > { %v2138_v34 = vpop.eup %1527  ;;  %v692_v35 = vmul.f32 1.442695, %v681_v31  ;;  %v683_v36 = vsub.f32 %v2090_v57, %v671_v32  ;;  %v1027_v37 = vsub.f32 %v817_v61, %v1005_v33 }
 0x146   : > { %v708_v38 = vsel %vm415_vm0, %v2138_v34, 0.0 }
 0x147   : > { %v2143_v39 = vpop.eup %1529  ;;  %1533 = vpow2.f32 %v692_v35  ;;  %v1035_v40 = vmul.f32 1.442695, %v1027_v37  ;;  %709 = vadd.xlane.f32.xlu0 %v708_v38  ;;  %v696_v42 = vmul.f32 1.442695, %v683_v36  ;;  %v1837_v36 = vmov 0.0  }
 0x148   : > { %v705_v41 = vsel %vm415_vm0, %v2143_v39, 0.0  ;;  %v2147_v43 = vpop.eup %1531  ;;  %416 = vst.msk [vmem:[#allocation2] sm:$0xff] %vm415_vm0, %v1837_v36 }
 0x149   : > { %706 = vadd.xlane.f32.xlu2 %v705_v41  ;;  %1535 = vpow2.f32 %v1035_v40  ;;  %v714_v53 = vsel %vm415_vm0, %v2147_v43, 0.0  ;;  %417 = vst.msk [vmem:[#allocation2 + $0x8] sm:$0xff] %vm415_vm0, %v1837_v36 }
 0x14a   : > { %1537 = vpow2.f32 %v696_v42  ;;  %419 = vst.msk [vmem:[#allocation3] sm:$0x3] %vm418_vm1, %v1837_v36 }
 0x14b   : > { %v1014_v44 = vpop.xlane.xlu1 %1013  ;;  %420 = vst.msk [vmem:[#allocation3 + $0x2] sm:$0x3] %vm418_vm1, %v1837_v36 }
 0x14c   : > { %v1030_v45 = vsub.f32 %v2103_v1, %v1014_v44  ;;  %v674_v46 = vpop.xlane.xlu0 %673  ;;  %v1008_v47 = vpop.xlane.xlu2 %1007 }
 0x14d   : > { %v2150_v48 = vpop.eup %1533  ;;  %v684_v49 = vsub.f32 %v2098_v62, %v674_v46  ;;  %v1028_v50 = vsub.f32 %v2101_v0, %v1008_v47 }
 0x14e   : > { %v1041_v51 = vmul.f32 1.442695, %v1030_v45  ;;  %v711_v52 = vsel %vm415_vm0, %v2150_v48, 0.0 }
 0x14f   : > { %v1037_v54 = vmul.f32 1.442695, %v1028_v50  ;;  %712 = vadd.xlane.f32.xlu1 %v711_v52  ;;  %715 = vadd.xlane.f32.xlu0 %v714_v53  ;;  %v2158_v55 = vpop.eup %1535  ;;  %v698_v56 = vmul.f32 1.442695, %v684_v49 }
 0x150   : > { %1539 = vpow2.f32 %v1041_v51  ;;  %v1051_v57 = vsel %vm418_vm1, %v2158_v55, 0.0  ;;  %v2162_v58 = vpop.eup %1537 }
 0x151   : > { %1541 = vpow2.f32 %v1037_v54  ;;  %1052 = vadd.xlane.f32.xlu2 %v1051_v57  ;;  %v717_v4 = vsel %vm415_vm0, %v2162_v58, 0.0 }
 0x152   : > { %1543 = vpow2.f32 %v698_v56 }
 0x153   : > { %v1017_v60 = vpop.xlane.xlu1 %1016 }
 0x154   : > { %v1031_v61 = vsub.f32 %v2113_v6, %v1017_v60  ;;  %v1011_v62 = vpop.xlane.xlu0 %1010  ;;  %v1020_v63 = vpop.xlane.xlu2 %1019 }
 0x155   : > { %v1029_v0 = vsub.f32 %v2111_v5, %v1011_v62  ;;  %v1032_v1 = vsub.f32 %v2115_v7, %v1020_v63 }
 0x156   : > { %v2167_v2 = vpop.eup %1539  ;;  %v1043_v3 = vmul.f32 1.442695, %v1031_v61 }
 0x157   : > { %v1045_v8 = vmul.f32 1.442695, %v1032_v1  ;;  %718 = vadd.xlane.f32.xlu1 %v717_v4  ;;  %v2171_v9 = vpop.eup %1541  ;;  %v1039_v10 = vmul.f32 1.442695, %v1029_v0  ;;  %v1060_v6 = vsel %vm418_vm1, %v2167_v2, 0.0 }
 0x158   : > { %1545 = vpow2.f32 %v1043_v3  ;;  %v1054_v5 = vsel %vm418_vm1, %v2171_v9, 0.0  ;;  %v2177_v7 = vpop.eup %1543 }
 0x159   : > { %1547 = vpow2.f32 %v1045_v8  ;;  %1061 = vadd.xlane.f32.xlu2 %v1060_v6  ;;  %1055 = vadd.xlane.f32.xlu0 %v1054_v5  ;;  %v720_v21 = vsel %vm415_vm0, %v2177_v7, 0.0 }
 0x15a   : > { %1549 = vpow2.f32 %v1039_v10 }
 0x15b   : > { %v677_v13 = vpop.xlane.xlu1 %676 }
 0x15c   : > { %v685_v14 = vsub.f32 %v2094_v59, %v677_v13  ;;  %v1026_v15 = vpop.xlane.xlu0 %1025  ;;  %v1023_v16 = vpop.xlane.xlu2 %1022 }
 0x15d   : > { %v1034_v17 = vsub.f32 %v2125_v12, %v1026_v15  ;;  %v1033_v18 = vsub.f32 %v2123_v11, %v1023_v16 }
 0x15e   : > { %v2182_v19 = vpop.eup %1545  ;;  %v700_v20 = vmul.f32 1.442695, %v685_v14 }
 0x15f   : > { %v1047_v22 = vmul.f32 1.442695, %v1033_v18  ;;  %721 = vadd.xlane.f32.xlu1 %v720_v21  ;;  %v2186_v23 = vpop.eup %1547  ;;  %v1049_v24 = vmul.f32 1.442695, %v1034_v17  ;;  %v1063_v59 = vsel %vm418_vm1, %v2182_v19, 0.0 }
 0x160   : > { %1551 = vpow2.f32 %v700_v20  ;;  %v1066_v12 = vsel %vm418_vm1, %v2186_v23, 0.0  ;;  %v2192_v11 = vpop.eup %1549 }
 0x161   : > { %1553 = vpow2.f32 %v1047_v22  ;;  %1064 = vadd.xlane.f32.xlu2 %v1063_v59  ;;  %1067 = vadd.xlane.f32.xlu0 %v1066_v12  ;;  %v1057_v27 = vsel %vm418_vm1, %v2192_v11, 0.0  ;;  %v750_v12 = vld [vmem:[#allocation2] sm:$0xff] }
 0x162   : > { %1555 = vpow2.f32 %v1049_v24 }
 0x166   : > { %v2194_v25 = vpop.eup %1551 }
 0x167   : > { %1058 = vadd.xlane.f32.xlu1 %v1057_v27  ;;  %v2198_v28 = vpop.eup %1553  ;;  %v723_v29 = vsel %vm415_vm0, %v2194_v25, 0.0 }
 0x168   : > { %v1069_v30 = vsel %vm418_vm1, %v2198_v28, 0.0  ;;  %v2204_v31 = vpop.eup %1555 }
 0x169   : > { %724 = vadd.xlane.f32.xlu2 %v723_v29  ;;  %1070 = vadd.xlane.f32.xlu0 %v1069_v30  ;;  %v1072_v32 = vsel %vm418_vm1, %v2204_v31, 0.0 }
 0x16f   : > { %1073 = vadd.xlane.f32.xlu1 %v1072_v32 }
 0x1b4   : > { %v704_v33 = vpop.xlane.xlu1 %703 }
 0x1b5   : > { %v726_v44 = vmul.f32 4.0, %v704_v33 }
 0x1ba   : > { %v710_v35 = vpop.xlane.xlu0 %709 }
 0x1bb   : > { %v728_v42 = vmul.f32 4.0, %v710_v35 }
 0x1bc   : > { %v707_v37 = vpop.xlane.xlu2 %706 }
 0x1bd   : > { %1557 = vrcp.f32 %v728_v42  ;;  %v727_v50 = vmul.f32 4.0, %v707_v37 }
 0x1be   : > { %1559 = vrcp.f32 %v726_v44 }
 0x1c2   : > { %v713_v38 = vpop.xlane.xlu1 %712  ;;  %v716_v40 = vpop.xlane.xlu0 %715 }
 0x1c3   : > { %v730_v45 = vmul.f32 4.0, %v716_v40  ;;  %v1558_v51 = vpop.eup %1557  ;;  %v729_v53 = vmul.f32 4.0, %v713_v38 }
 0x1c4   : > { %v1053_v41 = vpop.xlane.xlu2 %1052  ;;  %v1560_v52 = vpop.eup %1559  ;;  %v744_v61 = vmul.f32 %v1558_v51, %v2138_v34 }
 0x1c5   : > { %1561 = vrcp.f32 %v730_v45  ;;  %v1075_v57 = vmul.f32 4.0, %v1053_v41  ;;  %v742_v3 = vmul.f32 %v1560_v52, %v2133_v26 }
 0x1c6   : > { %1563 = vrcp.f32 %v727_v50  ;;  %v753_v6 = vsel %vm415_vm0, %v744_v61, 0.0 }
 0x1c7   : > { %v752_v13 = vsel %vm415_vm0, %v742_v3, 0.0  ;;  %v751_v3 = vld [vmem:[#allocation2 + $0x8] sm:$0xff] }
 0x1c8   : > { %v754_v26 = vadd.f32 %v753_v6, %v752_v13 }
 0x1ca   : > { %v719_v46 = vpop.xlane.xlu1 %718 }
 0x1cb   : > { %v1562_v56 = vpop.eup %1561  ;;  %v731_v62 = vmul.f32 4.0, %v719_v46 }
 0x1cc   : > { %v1056_v47 = vpop.xlane.xlu0 %1055  ;;  %v1062_v49 = vpop.xlane.xlu2 %1061  ;;  %v746_v4 = vmul.f32 %v1562_v56, %v2147_v43 }
 0x1cd   : > { %v1076_v63 = vmul.f32 4.0, %v1056_v47  ;;  %v1078_v8 = vmul.f32 4.0, %v1062_v49  ;;  %v1564_v34 = vpop.eup %1563 }
 0x1ce   : > { %v755_v14 = vsel %vm415_vm0, %v746_v4, 0.0 }
 0x1cf   : > { %v756_v21 = vadd.f32 %v755_v14, %v754_v26 }
 0x1d2   : > { %v722_v54 = vpop.xlane.xlu1 %721 }
 0x1d3   : > { %v732_v60 = vmul.f32 4.0, %v722_v54 }
 0x1d4   : > { %v1068_v0 = vpop.xlane.xlu0 %1067  ;;  %v1065_v1 = vpop.xlane.xlu2 %1064 }
 0x1d5   : > { %1565 = vrcp.f32 %v732_v60  ;;  %v1079_v10 = vmul.f32 4.0, %v1065_v1  ;;  %v1080_v5 = vmul.f32 4.0, %v1068_v0 }
 0x1d6   : > { %1567 = vrcp.f32 %v729_v53 }
 0x1d7   : > { %1569 = vrcp.f32 %v1075_v57 }
 0x1d8   : > { %1571 = vrcp.f32 %v731_v62 }
 0x1d9   : > { %1573 = vrcp.f32 %v1076_v63  ;;  %v1099_v63 = vld [vmem:[#allocation3] sm:$0x3] }
 0x1da   : > { %1575 = vrcp.f32 %v1078_v8  ;;  %v1059_v15 = vpop.xlane.xlu1 %1058 }
 0x1db   : > { %v1566_v16 = vpop.eup %1565  ;;  %1577 = vrcp.f32 %v1079_v10  ;;  %v1077_v17 = vmul.f32 4.0, %v1059_v15 }
 0x1dc   : > { %v1568_v43 = vpop.eup %1567  ;;  %v748_v18 = vmul.f32 %v1566_v16, %v2177_v7  ;;  %1579 = vrcp.f32 %v1080_v5  ;;  %v1071_v22 = vpop.xlane.xlu0 %1070  ;;  %v743_v7 = vmul.f32 %v1564_v34, %v2143_v39  ;;  %v1100_v16 = vld [vmem:[#allocation3 + $0x2] sm:$0x3] }
 0x1dd   : > { %v1570_v20 = vpop.eup %1569  ;;  %1581 = vrcp.f32 %v1077_v17  ;;  %v725_v24 = vpop.xlane.xlu2 %724  ;;  %v1081_v29 = vmul.f32 4.0, %v1071_v22  ;;  %v745_v33 = vmul.f32 %v1568_v43, %v2150_v48 }
 0x1de   : > { %v1572_v59 = vpop.eup %1571  ;;  %v757_v27 = vsel %vm415_vm0, %v748_v18, 0.0  ;;  %v733_v30 = vmul.f32 4.0, %v725_v24  ;;  %v1091_v41 = vmul.f32 %v1570_v20, %v2158_v55  ;;  %v759_v51 = vsel %vm415_vm0, %v743_v7, 0.0 }
 0x1df   : > { %v1574_v32 = vpop.eup %1573  ;;  %v758_v35 = vadd.f32 %v757_v27, %v756_v21  ;;  %1583 = vrcp.f32 %v1081_v29  ;;  %v747_v42 = vmul.f32 %v1572_v59, %v2162_v58  ;;  %v760_v46 = vsel %vm415_vm0, %v745_v33, 0.0 }
 0x1e0   : > { %v1576_v36 = vpop.eup %1575  ;;  %1585 = vrcp.f32 %v733_v30  ;;  %v1092_v47 = vmul.f32 %v1574_v32, %v2171_v9  ;;  %v1101_v58 = vsel %vm418_vm1, %v1091_v41, 0.0  ;;  %v761_v9 = vadd.f32 %v760_v46, %v759_v51 }
 0x1e1   : > { %v1578_v37 = vpop.eup %1577  ;;  %v766_v38 = vadd.f32 %v758_v35, %v750_v12  ;;  %v1094_v49 = vmul.f32 %v1576_v36, %v2167_v2  ;;  %v762_v52 = vsel %vm415_vm0, %v747_v42, 0.0 }
 0x1e2   : > { %v1580_v40 = vpop.eup %1579  ;;  %v1074_v44 = vpop.xlane.xlu1 %1073  ;;  %v1095_v39 = vmul.f32 %v1578_v37, %v2182_v19  ;;  %v1108_v19 = vsel %vm418_vm1, %v1092_v47, 0.0  ;;  %v763_v62 = vadd.f32 %v762_v52, %v761_v9 }
 0x1e3   : > { %v1582_v45 = vpop.eup %1581  ;;  %768 = vst.msk [vmem:[#allocation2] sm:$0xff] %vm415_vm0, %v766_v38  ;;  %v1082_v48 = vmul.f32 4.0, %v1074_v44  ;;  %v1096_v53 = vmul.f32 %v1580_v40, %v2186_v23 }
 0x1e4   : > { %v1093_v50 = vmul.f32 %v1582_v45, %v2192_v11  ;;  %v1109_v11 = vsel %vm418_vm1, %v1094_v49, 0.0  ;;  %v1104_v60 = vsel %vm418_vm1, %v1095_v39, 0.0 }
 0x1e5   : > { %1587 = vrcp.f32 %v1082_v48  ;;  %v1584_v55 = vpop.eup %1583  ;;  %v1111_v0 = vsel %vm418_vm1, %v1096_v53, 0.0  ;;  %v1110_v10 = vadd.f32 %v1109_v11, %v1108_v19 }
 0x1e6   : > { %v1102_v54 = vsel %vm418_vm1, %v1093_v50, 0.0  ;;  %v1586_v56 = vpop.eup %1585  ;;  %v1097_v2 = vmul.f32 %v1584_v55, %v2198_v28 }
 0x1e7   : > { %v1103_v57 = vadd.f32 %v1102_v54, %v1101_v58  ;;  %v749_v61 = vmul.f32 %v1586_v56, %v2194_v25  ;;  %v1112_v13 = vadd.f32 %v1111_v0, %v1110_v10 }
 0x1e8   : > { %v1106_v1 = vsel %vm418_vm1, %v1097_v2, 0.0 }
 0x1e9   : > { %v1105_v23 = vadd.f32 %v1104_v60, %v1103_v57  ;;  %v764_v28 = vsel %vm415_vm0, %v749_v61, 0.0 }
 0x1ea   : > { %v1122_v4 = vld [vmem:[#allocation2] sm:$0xff]  ;;  %v765_v5 = vadd.f32 %v764_v28, %v763_v62 }
 0x1eb   : > { %v1588_v8 = vpop.eup %1587  ;;  %v1107_v6 = vadd.f32 %v1106_v1, %v1105_v23  ;;  %v1124_v34 = vsel %vm415_vm0, %v1122_v4, 0.0 }
 0x1ec   : > { %v1098_v25 = vmul.f32 %v1588_v8, %v2204_v31  ;;  %1126 = vst [vmem:[%s2246_s24] sm:$0xff] %v1124_v34  ;;  %v767_v15 = vadd.f32 %v765_v5, %v751_v3 }
 0x1ed   : > { %v1115_v14 = vadd.f32 %v1107_v6, %v1099_v63 }
 0x1ee   : > { %v1113_v26 = vsel %vm418_vm1, %v1098_v25, 0.0  ;;  %769 = vst.msk [vmem:[#allocation2 + $0x8] sm:$0xff] %vm415_vm0, %v767_v15 }
 0x1ef   : > { %1117 = vst.msk [vmem:[#allocation3] sm:$0x3] %vm418_vm1, %v1115_v14  ;;  %v1114_v17 = vadd.f32 %v1113_v26, %v1112_v13 }
 0x1f1   : > { %v1116_v31 = vadd.f32 %v1114_v17, %v1100_v16 }
 0x1f3   : > { %1118 = vst.msk [vmem:[#allocation3 + $0x2] sm:$0x3] %vm418_vm1, %v1116_v31 }
 0x1f5   : > { %v1123_v18 = vld [vmem:[#allocation2 + $0x8] sm:$0xff] }
 0x1f6   : > { %v1128_v43 = vld [vmem:[#allocation3] sm:$0x3]  ;;  %v1125_v21 = vsel %vm415_vm0, %v1123_v18, 0.0 }
 0x1f7   : > { %v1131_v20 = vsel %vm1130_vm2, %v1128_v43, 0.0  ;;  %1127 = vst [vmem:[%s2246_s24 + $0x8] sm:$0xff] %v1125_v21 }
 0x1f8   : > { %1133 = vst [vmem:[%s2267_s8] sm:$0x3] %v1131_v20 }
 0x1f9   : > { %1736 = shalt.err (!%p1733_p13)
}
 0x1fa   : > { %s1838_s24 = smov 128   ;;  %s1839_s30 = smov 8   ;;  %v1129_v22 = vld [vmem:[#allocation3 + $0x2] sm:$0x3] }
 0x1fb   : > { %1442 = dma.vmem_to_hbm [thread:$0]  (%p1927_p9), %s2263_s25, 256, %s2265_s20, %s1136_s29, %s1838_s24, %s1838_s24, %s1839_s30   ;;  %v1132_v24 = vsel %vm1130_vm2, %v1129_v22, 0.0 }
 0x1fc   : > { %1134 = vst [vmem:[%s2267_s8 + $0x2] sm:$0x3] %v1132_v24  ;;  %s1141_s11 = scalar_lea.sflag [#allocation14], %s1989_s18  ;;  %s1751_s16 = sshra.s32 %s2276_s0, 4  ;;  %s1752_s16 = int_to_ptr.hbm [resolvable:$true] %s1751_s16 }
 0x1fd   : > { %s1753_s10 = scalar_lea.hbm %s1752_s16, 4  ;;  %s1757_s26 = scalar_lea.hbm %s2336_s5, 8 }
 0x1fe   : > { %p1754_p0 = scmp.ne.s32.totalorder %s1752_s16, %s1753_s10  ;;  %p1758_p3 = scmp.lt.s32.totalorder %s1752_s16, %s2336_s5 }
 0x1ff   : > { %p1759_p4 = scmp.lt.s32.totalorder %s1757_s26, %s1753_s10 }
 0x200   : > { %p1755_p1 = pnand %p1754_p0, %p1927_p9 }
 0x201   : > { %p1760_p5 = por %p1759_p4, %p1758_p3 }
 0x202   : > { %p1756_p2 = pneg %p1755_p1 }
 0x204   : > { %p1761_p6 = pnand %p1760_p5, %p1756_p2 }
 0x206   : > { %1764 = shalt.err (!%p1761_p6)
}
 0x207   : > { %s1840_s18 = smov 32   ;;  %s1841_s25 = smov 2  }
 0x208   : > { %1443 = dma.vmem_to_hbm [thread:$0]  (%p1927_p9), %s2273_s21, 64, %s2276_s0, %s1141_s11, %s1840_s18, %s1840_s18, %s1841_s25  }
 0x209 PF: > { %s2359_s20 = sld [smem:[#allocation20_spill]]  ;;  %p1460_p7 = pnand %p1368_p12, %p1934_p11 }
 0x20a   : > { %s2361_s29 = sld [smem:[#allocation22_spill]] }
 0x20b   : > { %p1461_p8 = pneg %p1460_p7 }
 0x20f   : > { %s1187_s9 = sand.u32 1, %s2359_s20  }
 0x210   : > { %s1188_s12 = scalar_lea.sflag [#allocation6], %s1187_s9 }
 0x211   : > { %1802 = dma.done.wait (%p1461_p8), %s1188_s12, 256  }
 0x212   : > { %1804 = vsyncadd (%p1461_p8), %s1188_s12, 4294967040  ;;  %s1198_s14 = scalar_lea.sflag [#allocation14], %s1187_s9 }
 0x213   : > { %1806 = dma.done.wait (%p1461_p8), %s1198_s14, 64  }
 0x214   : > { %1808 = vsyncadd (%p1461_p8), %s1198_s14, 4294967232  ;;  %s31_s23 = sadd.s32 1, %s2361_s29   ;;  %s2362_s6 = sld [smem:[#allocation21_spill]] }
 0x215   : > { %p28_p10 = scmp.ge.s32.totalorder %s31_s23, 4   ;;  %s2363_s20 = sld [smem:[#allocation24_spill]] }
 0x216   : > { %s2364_s0 = sld [smem:[#allocation23_spill]]  ;;  %s2365_s18 = smov %s1815_s19 }
 0x217   : > { %s2367_s21 = smov %s1827_s22 }
 0x218   :  { %30 = sbr.rel (!%p28_p10) target bundleno = 15 (0xf), region = 143 }
 0x21a   : > { %s2366_s19 = smov %s2362_s6 }
 0x21c   : > { %s2368_s22 = smov %s2364_s0 }
 0x21d   :  { %1204 = vsyncpa [#allocation5], 1 }
 0x21e   :  { %1206 = vsyncpa [#allocation5 + $0x1], 1 }
 0x21f   :  { %1207 = vsyncpa [#allocation8], 1 }
 0x220   :  { %1209 = vsyncpa [#allocation8 + $0x1], 1 }
 0x221   :  { %1210 = vsyncpa [#allocation11], 1 }
 0x222   :  { %1212 = vsyncpa [#allocation11 + $0x1], 1 }
 0x223   :  { %1213 = vsyncpa [#allocation6], 1 }
 0x224   :  { %1215 = vsyncpa [#allocation6 + $0x1], 1 }
 0x225   :  { %1216 = vsyncpa [#allocation14], 1 }
 0x226   :  { %1218 = vsyncpa [#allocation14 + $0x1], 1 }

</bundles_post_ra>
